<compile_context>
chip_gen: v6e
topology: v6e:2x2x1
jax: 0.10.0
libtpu: 0.0.40
codegen_flags: <defaults>
</compile_context>

<pallas_src>
import functools
import math

import jax
import jax.numpy as jnp
from jax.experimental import pallas as pl
from jax.experimental.pallas import tpu as pltpu


_INV_SQRT2 = 0.7071067811865476


def _round_up(v, m):
    return ((v + m - 1) // m) * m


def _pick_tile(dim, *, unit, cap):
    """Largest tile (multiple of `unit`, <= cap) minimizing padding of `dim`."""
    limit = min(cap, _round_up(dim, unit))
    best_t, best_key = unit, None
    for t in range(unit, limit + 1, unit):
        key = (_round_up(dim, t) - dim, -t)
        if best_key is None or key < best_key:
            best_key, best_t = key, t
    return best_t


def _erf_approx(x):
    # Abramowitz & Stegun 7.1.26, |err| ~1.5e-7 (plenty for f32 GELU).
    a1, a2, a3 = 0.254829592, -0.284496736, 1.421413741
    a4, a5, p = -1.453152027, 1.061405429, 0.3275911
    ax = jnp.abs(x)
    t = 1.0 / (1.0 + p * ax)  # exact divide (approx reciprocal flagged as accuracy risk)
    poly = ((((a5 * t + a4) * t + a3) * t + a2) * t + a1) * t
    y = 1.0 - poly * jnp.exp(-(ax * ax))
    return jnp.where(x < 0.0, -y, y)


def _gelu_exact(z):
    # nn.GELU() default ("none" approximation): 0.5*z*(1 + erf(z/sqrt(2)))
    return 0.5 * z * (1.0 + _erf_approx(z * _INV_SQRT2))


def _make_kernel(x_full_k, tk, use_scratch):
    def kernel(x_ref, w_ref, b_ref, o_ref, *scratch):
        # f32 outputs accumulate straight into the resident output block.
        acc_ref = scratch[0] if use_scratch else o_ref
        k = pl.program_id(2)

        @pl.when(k == 0)
        def _():
            acc_ref[...] = jnp.zeros_like(acc_ref)

        if x_full_k:
            # x is a resident (tm, Kp) panel; slice out the current K chunk.
            off = pl.multiple_of(k * tk, tk)
            x_tile = x_ref[:, pl.ds(off, tk)]
        else:
            x_tile = x_ref[...]

        # Plain (tm, tk) x (tk, tn) MXU matmul (weight pre-transposed to (K, N)).
        acc_ref[...] += jnp.dot(
            x_tile,
            w_ref[...],
            preferred_element_type=jnp.float32,
            precision=jax.lax.Precision.HIGHEST,
        )

        @pl.when(k == pl.num_programs(2) - 1)
        def _():
            # Fused bias + exact GELU epilogue (VPU/EUP only; no extra HBM pass).
            z = acc_ref[...].astype(jnp.float32) + b_ref[...].astype(jnp.float32)
            o_ref[...] = _gelu_exact(z).astype(o_ref.dtype)

    return kernel


def _vmem_budget_bytes():
    # Generation-aware: ~48 MiB on v7x (64 MiB VMEM), ~96 MiB on v5e/v6e (128 MiB).
    try:
        cap = int(pltpu.get_tpu_info().vmem_capacity_bytes)
    except Exception:
        cap = 64 * 1024 * 1024
    return (3 * cap) // 4


@functools.partial(jax.jit, static_argnames=("n_out", "tn", "tk"))
def _linear_gelu_padded(x, w_t, b2, *, n_out, tn, tk):
    """x: (..., K); w_t: (Kp, Np) pre-transposed+padded weight; b2: (1, Np)."""
    orig_leading = x.shape[:-1]
    K = x.shape[-1]
    Kp, Np = w_t.shape
    assert Kp % tk == 0 and Np % tn == 0 and Kp >= K

    x2d = x.reshape(-1, K)
    M = x2d.shape[0]
    out_dtype = x.dtype

    itemsize = jnp.dtype(x.dtype).itemsize
    sub = {4: 8, 2: 16, 1: 32}.get(itemsize, 8)   # sublane packing for the dtype
    tm = _pick_tile(M, unit=sub, cap=512)
    Mp = _round_up(M, tm)

    # Megacore (v7x 2 TCs): ensure >= 2 "parallel" output tiles when possible.
    if (Mp // tm) * (Np // tn) < 2 and tm > sub:
        tm = max(_round_up(tm // 2, sub), sub)
        Mp = _round_up(M, tm)

    if (Mp, Kp) != (M, K):
        x2d = jnp.pad(x2d, ((0, Mp - M), (0, Kp - K)))

    budget = _vmem_budget_bytes()
    xb = jnp.dtype(x2d.dtype).itemsize
    wb = jnp.dtype(w_t.dtype).itemsize
    ob = jnp.dtype(out_dtype).itemsize
    bb = jnp.dtype(b2.dtype).itemsize
    use_scratch = out_dtype != jnp.float32   # keep f32 scratch only for low-precision out

    def working_set(x_cols):
        ws = 2 * tm * x_cols * xb + 2 * tk * tn * wb + 2 * tm * tn * ob + 2 * tn * bb
        if use_scratch:
            ws += tm * tn * 4
        return ws

    # Keep x resident as a full-K panel when it fits (fetched once per M tile
    # instead of once per (M tile, N tile) pair).
    x_full_k = working_set(Kp) <= budget - (4 * 1024 * 1024)
    ws_bytes = working_set(Kp if x_full_k else tk)
    vmem_limit = int(min(budget, max(32 * 1024 * 1024, 2 * ws_bytes)))

    grid = (Mp // tm, Np // tn, Kp // tk)

    if x_full_k:
        x_spec = pl.BlockSpec((tm, Kp), lambda i, j, k: (i, 0))
    else:
        x_spec = pl.BlockSpec((tm, tk), lambda i, j, k: (i, k))

    scratch_shapes = [pltpu.VMEM((tm, tn), jnp.float32)] if use_scratch else []

    x_reads = Mp * Kp * xb * (1 if x_full_k else (Np // tn))
    cost = pl.CostEstimate(
        flops=2 * Mp * Np * Kp,
        transcendentals=Mp * Np,  # one exp per output element (erf epilogue)
        bytes_accessed=x_reads + Kp * Np * wb * (Mp // tm) + Mp * Np * ob,
    )

    out_padded = pl.pallas_call(
        _make_kernel(x_full_k, tk, use_scratch),
        out_shape=jax.ShapeDtypeStruct((Mp, Np), out_dtype),
        grid_spec=pltpu.PrefetchScalarGridSpec(
            num_scalar_prefetch=0,
            grid=grid,
            in_specs=[
                x_spec,                                          # x tile / panel
                pl.BlockSpec((tk, tn), lambda i, j, k: (k, j)),  # W^T tile (K, N)
                pl.BlockSpec((1, tn), lambda i, j, k: (0, j)),   # bias tile
            ],
            out_specs=pl.BlockSpec((tm, tn), lambda i, j, k: (i, j)),
            scratch_shapes=scratch_shapes,
        ),
        compiler_params=pltpu.CompilerParams(
            dimension_semantics=("parallel", "parallel", "arbitrary"),
            vmem_limit_bytes=vmem_limit,
        ),
        cost_estimate=cost,
    )(x2d, w_t, b2)

    return out_padded[:M, :n_out].reshape(*orig_leading, n_out)


class LinearGelu:
    """y = gelu(x @ weight.T + bias) with exact (erf) GELU.

    Weight transpose + padding are hoisted out of the per-call hot path
    (mirrors _IPEXlinearGeluRef holding its nn.Linear).
    """

    def __init__(self, weight, bias):
        N, K = weight.shape
        assert bias.shape == (N,)
        self.n_out = N
        # Lane-dense tiles (multiples of 128) chosen once, minimizing padding.
        self.tn = _pick_tile(N, unit=128, cap=1024)
        self.tk = _pick_tile(K, unit=128, cap=1024)
        Np = _round_up(N, self.tn)
        Kp = _round_up(K, self.tk)
        w_t = jnp.transpose(weight)                         # (K, N), done once
        if (Kp, Np) != (K, N):
            w_t = jnp.pad(w_t, ((0, Kp - K), (0, Np - N)))  # done once
        b2 = bias.reshape(1, N)
        if Np != N:
            b2 = jnp.pad(b2, ((0, 0), (0, Np - N)))
        self.w_t = jax.device_put(w_t)
        self.b2 = jax.device_put(b2)

    def __call__(self, x):
        # TODO(synk): optional bf16 x/W fast path (cast here, keep f32 accumulation).
        return _linear_gelu_padded(
            x, self.w_t, self.b2, n_out=self.n_out, tn=self.tn, tk=self.tk
        )


def _reference(x, weight, bias):
    z = jnp.einsum("...k,nk->...n", x, weight,
                   precision=jax.lax.Precision.HIGHEST) + bias
    return jax.nn.gelu(z, approximate=False)   # exact erf GELU == nn.GELU() default


if __name__ == "__main__":
    key = jax.random.PRNGKey(0)

    # Shapes implied by the forward: x (batch, seq, hidden) -> Linear(hidden->out) -> GELU.
    batch, seq, hidden, out_features = 2, 8, 32, 64
    k1, k2, k3, k4 = jax.random.split(key, 4)
    x = jax.random.normal(k1, (batch, seq, hidden), dtype=jnp.float32)
    bound = 1.0 / math.sqrt(hidden)
    weight = jax.random.uniform(k2, (out_features, hidden), jnp.float32, -bound, bound)
    bias = jax.random.uniform(k3, (out_features,), jnp.float32, -bound, bound)

    mod = LinearGelu(weight, bias)
    y = mod(x)
    jax.block_until_ready(y)
    assert y.shape == (batch, seq, out_features)
    y_ref = _reference(x, weight, bias)
    assert jnp.allclose(y, y_ref, atol=1e-4, rtol=1e-4), float(jnp.max(jnp.abs(y - y_ref)))

    # Second check: exercises the K-reduction grid axis (K > tk), lane padding,
    # multiple M tiles, and the resident full-K x panel.
    b2s, s2, h2, o2 = 2, 24, 1536, 384
    ka, kb, kc = jax.random.split(k4, 3)
    x2 = jax.random.normal(ka, (b2s, s2, h2), dtype=jnp.float32)
    bound2 = 1.0 / math.sqrt(h2)
    w2 = jax.random.uniform(kb, (o2, h2), jnp.float32, -bound2, bound2)
    bias2 = jax.random.uniform(kc, (o2,), jnp.float32, -bound2, bound2)

    mod2 = LinearGelu(w2, bias2)
    y2 = mod2(x2)
    jax.block_until_ready(y2)
    assert y2.shape == (b2s, s2, o2)
    y2_ref = _reference(x2, w2, bias2)
    assert jnp.allclose(y2, y2_ref, atol=1e-4, rtol=1e-4), float(jnp.max(jnp.abs(y2 - y2_ref)))

    print("KERNEL_OK")
</pallas_src>

<mosaic_0001>
module attributes {stable_mosaic.version = 11 : i64} {
  func.func @kernel(%arg0: i32, %arg1: i32, %arg2: i32, %arg3: memref<8x128xf32, #tpu.memory_space<vmem>>, %arg4: memref<128x128xf32, #tpu.memory_space<vmem>>, %arg5: memref<1x128xf32, #tpu.memory_space<vmem>>, %arg6: memref<8x128xf32, #tpu.memory_space<vmem>>) attributes {dimension_semantics = [#tpu.dimension_semantics<parallel>, #tpu.dimension_semantics<parallel>, #tpu.dimension_semantics<arbitrary>], iteration_bounds = array<i64: 2, 1, 1>, scalar_prefetch = 0 : i64, scratch_operands = 0 : i64, tpu.core_type = #tpu.core_type<tc>, window_params = [{transform_indices = @transform_0, window_bounds = array<i64: 8, 128>}, {transform_indices = @transform_1, window_bounds = array<i64: 128, 128>}, {transform_indices = @transform_2, window_bounds = array<i64: 1, 128>}, {transform_indices = @transform_3, window_bounds = array<i64: 8, 128>}]} {
    %c0_i32 = arith.constant 0 : i32
    %0 = arith.cmpi eq, %arg2, %c0_i32 : i32
    %1 = arith.extui %0 : i1 to i32
    %c0_i32_0 = arith.constant 0 : i32
    %2 = arith.cmpi ne, %1, %c0_i32_0 : i32
    scf.if %2 {
      %cst_9 = arith.constant 0.000000e+00 : f32
      %15 = vector.broadcast %cst_9 : f32 to vector<8x128xf32>
      %c0_10 = arith.constant 0 : index
      %c0_11 = arith.constant 0 : index
      %16 = vector.load %arg6[%c0_10, %c0_11] : memref<8x128xf32, #tpu.memory_space<vmem>>, vector<8x128xf32>
      tpu.vector_store %arg6[%c0_10, %c0_11], %15 {strides = array<i32>} : memref<8x128xf32, #tpu.memory_space<vmem>>, vector<8x128xf32>,
    } else {
    }
    %c128_i32 = arith.constant 128 : i32
    %3 = arith.muli %arg2, %c128_i32 : i32
    %4 = tpu.assume_multiple %3, 128 : i32
    %c0 = arith.constant 0 : index
    %5 = arith.index_cast %4 : i32 to index
    %6 = vector.load %arg3[%c0, %5] : memref<8x128xf32, #tpu.memory_space<vmem>>, vector<8x128xf32>
    %c0_1 = arith.constant 0 : index
    %c0_2 = arith.constant 0 : index
    %7 = vector.load %arg6[%c0_1, %c0_2] : memref<8x128xf32, #tpu.memory_space<vmem>>, vector<8x128xf32>
    %c0_3 = arith.constant 0 : index
    %c0_4 = arith.constant 0 : index
    %8 = vector.load %arg4[%c0_3, %c0_4] : memref<128x128xf32, #tpu.memory_space<vmem>>, vector<128x128xf32>
    %cst = arith.constant dense<0.000000e+00> : vector<8x128xf32>
    %9 = tpu.matmul %6, %8, %cst {dimension_numbers = #tpu.dot_dimension_numbers<[1], [0], [0], [1], [0, 0, 1, 1], [], []>, precision = #tpu.contract_precision<fp32>} : vector<8x128xf32>, vector<128x128xf32>, vector<8x128xf32> -> vector<8x128xf32>
    %10 = arith.addf %7, %9 : vector<8x128xf32>
    %c0_5 = arith.constant 0 : index
    %c0_6 = arith.constant 0 : index
    %11 = vector.load %arg6[%c0_5, %c0_6] : memref<8x128xf32, #tpu.memory_space<vmem>>, vector<8x128xf32>
    tpu.vector_store %arg6[%c0_5, %c0_6], %10 {strides = array<i32>} : memref<8x128xf32, #tpu.memory_space<vmem>>, vector<8x128xf32>,
    %c0_i32_7 = arith.constant 0 : i32
    %12 = arith.cmpi eq, %arg2, %c0_i32_7 : i32
    %13 = arith.extui %12 : i1 to i32
    %c0_i32_8 = arith.constant 0 : i32
    %14 = arith.cmpi ne, %13, %c0_i32_8 : i32
    scf.if %14 {
      %c0_9 = arith.constant 0 : index
      %c0_10 = arith.constant 0 : index
      %15 = vector.load %arg6[%c0_9, %c0_10] : memref<8x128xf32, #tpu.memory_space<vmem>>, vector<8x128xf32>
      %c0_11 = arith.constant 0 : index
      %c0_12 = arith.constant 0 : index
      %16 = vector.load %arg5[%c0_11, %c0_12] : memref<1x128xf32, #tpu.memory_space<vmem>>, vector<1x128xf32>
      %17 = vector.broadcast %16 : vector<1x128xf32> to vector<8x128xf32>
      %18 = arith.addf %15, %17 : vector<8x128xf32>
      %cst_13 = arith.constant 5.000000e-01 : f32
      %19 = vector.broadcast %cst_13 : f32 to vector<8x128xf32>
      %20 = arith.mulf %19, %18 : vector<8x128xf32>
      %cst_14 = arith.constant 0.707106769 : f32
      %21 = vector.broadcast %cst_14 : f32 to vector<8x128xf32>
      %22 = arith.mulf %18, %21 : vector<8x128xf32>
      %23 = math.absf %22 : vector<8x128xf32>
      %cst_15 = arith.constant 0.327591091 : f32
      %24 = vector.broadcast %cst_15 : f32 to vector<8x128xf32>
      %25 = arith.mulf %24, %23 : vector<8x128xf32>
      %cst_16 = arith.constant 1.000000e+00 : f32
      %26 = vector.broadcast %cst_16 : f32 to vector<8x128xf32>
      %27 = arith.addf %26, %25 : vector<8x128xf32>
      %cst_17 = arith.constant 1.000000e+00 : f32
      %28 = vector.broadcast %cst_17 : f32 to vector<8x128xf32>
      %29 = arith.divf %28, %27 : vector<8x128xf32>
      %cst_18 = arith.constant 1.06140542 : f32
      %30 = vector.broadcast %cst_18 : f32 to vector<8x128xf32>
      %31 = arith.mulf %30, %29 : vector<8x128xf32>
      %cst_19 = arith.constant -1.45315206 : f32
      %32 = vector.broadcast %cst_19 : f32 to vector<8x128xf32>
      %33 = arith.addf %31, %32 : vector<8x128xf32>
      %34 = arith.mulf %33, %29 : vector<8x128xf32>
      %cst_20 = arith.constant 1.42141378 : f32
      %35 = vector.broadcast %cst_20 : f32 to vector<8x128xf32>
      %36 = arith.addf %34, %35 : vector<8x128xf32>
      %37 = arith.mulf %36, %29 : vector<8x128xf32>
      %cst_21 = arith.constant -0.284496725 : f32
      %38 = vector.broadcast %cst_21 : f32 to vector<8x128xf32>
      %39 = arith.addf %37, %38 : vector<8x128xf32>
      %40 = arith.mulf %39, %29 : vector<8x128xf32>
      %cst_22 = arith.constant 0.254829586 : f32
      %41 = vector.broadcast %cst_22 : f32 to vector<8x128xf32>
      %42 = arith.addf %40, %41 : vector<8x128xf32>
      %43 = arith.mulf %42, %29 : vector<8x128xf32>
      %44 = arith.mulf %23, %23 : vector<8x128xf32>
      %cst_23 = arith.constant 0.000000e+00 : f32
      %45 = vector.broadcast %cst_23 : f32 to vector<8x128xf32>
      %46 = arith.subf %45, %44 : vector<8x128xf32>
      %47 = math.exp %46 : vector<8x128xf32>
      %48 = arith.mulf %43, %47 : vector<8x128xf32>
      %cst_24 = arith.constant 1.000000e+00 : f32
      %49 = vector.broadcast %cst_24 : f32 to vector<8x128xf32>
      %50 = arith.subf %49, %48 : vector<8x128xf32>
      %cst_25 = arith.constant 0.000000e+00 : f32
      %51 = vector.broadcast %cst_25 : f32 to vector<8x128xf32>
      %52 = arith.cmpf olt, %22, %51 : vector<8x128xf32>
      %cst_26 = arith.constant 0.000000e+00 : f32
      %53 = vector.broadcast %cst_26 : f32 to vector<8x128xf32>
      %54 = arith.subf %53, %50 : vector<8x128xf32>
      %55 = arith.select %52, %54, %50 : vector<8x128xi1>, vector<8x128xf32>
      %cst_27 = arith.constant 1.000000e+00 : f32
      %56 = vector.broadcast %cst_27 : f32 to vector<8x128xf32>
      %57 = arith.addf %56, %55 : vector<8x128xf32>
      %58 = arith.mulf %20, %57 : vector<8x128xf32>
      %c0_28 = arith.constant 0 : index
      %c0_29 = arith.constant 0 : index
      %59 = vector.load %arg6[%c0_28, %c0_29] : memref<8x128xf32, #tpu.memory_space<vmem>>, vector<8x128xf32>
      tpu.vector_store %arg6[%c0_28, %c0_29], %58 {strides = array<i32>} : memref<8x128xf32, #tpu.memory_space<vmem>>, vector<8x128xf32>,
    } else {
    }
    return
  }
  func.func @transform_0(%arg0: i32, %arg1: i32, %arg2: i32) -> (i32, i32) {
    %c0_i32 = arith.constant 0 : i32
    %c0_i32_0 = arith.constant 0 : i32
    return %arg0, %c0_i32 : i32, i32
  }
  func.func @transform_1(%arg0: i32, %arg1: i32, %arg2: i32) -> (i32, i32) {
    %c0_i32 = arith.constant 0 : i32
    return %arg2, %arg1 : i32, i32
  }
  func.func @transform_2(%arg0: i32, %arg1: i32, %arg2: i32) -> (i32, i32) {
    %c0_i32 = arith.constant 0 : i32
    %c0_i32_0 = arith.constant 0 : i32
    return %c0_i32, %arg1 : i32, i32
  }
  func.func @transform_3(%arg0: i32, %arg1: i32, %arg2: i32) -> (i32, i32) {
    %c0_i32 = arith.constant 0 : i32
    return %arg0, %arg1 : i32, i32
  }
}

</mosaic_0001>

<bundles_post_ra>
// kernel: _linear_gelu_padded.1
= control target key start
LH: loop header
LB: loop body
LE: loop exit
PB: predicated region body
PF: predicated region fallthrough
CT: control target
= control target key end

     0   :  { %8 = vsyncpa [#allocation3], 0  ;;  %s1495_s12 = smov 0   ;;  %s1497_s13 = smov 0   ;;  %s1929_s0 = inlined_call_operand.vmem [shape: f32[16,128], index: 0, kind: input, shape index: {}]   ;;  %s1930_s1 = inlined_call_operand.hbm [shape: f32[128,128], index: 1, kind: input, shape index: {}]   ;;  %s1931_s2 = inlined_call_operand.vmem [shape: f32[1,128], index: 2, kind: input, shape index: {}]   ;;  %s1932_s3 = inlined_call_operand.vmem [shape: f32[16,128], index: 3, kind: output, shape index: {}]  }
   0x1   :  { %s1499_s14 = smov 0  }
   0x2 LB: > { %s1048_s15 = sadd.s32 4294967295, %s1468_s14   ;;  %s33_s16 = sadd.s32 1, %s1464_s13  ;;  %s1468_s14 = sphi %s1499_s14, %s14_s14   ;;  %s1464_s13 = sphi %s1497_s13, %s1936_s13   ;;  %s1460_s12 = sphi %s1495_s12, %s1935_s12  }
   0x3   : > { %p35_p0 = scmp.ge.s32.totalorder %s33_s16, 2  ;;  %p1050_p1 = scmp.ge.s32.totalorder %s1468_s14, 1 }
   0x4   : > { %p146_p2 = scmp.lt.s32.totalorder %s1468_s14, 3  ;;  %p1520_p4 = scmp.eq.s32.totalorder %s1048_s15, 0 }
   0x5   : > { %s1938_s16 = smov (%p35_p0, %s33_s16), 0  ;;  %s1470_s19 = smov [#allocation2]  }
   0x6   : > { %p1516_p3 = pnand %p1050_p1, %p146_p2  ;;  %s162_s20 = sshll.u32 %s1470_s19, 4  ;;  %s163_s20 = int_to_ptr.vmem [resolvable:$true] %s162_s20 }
   0x7   : > { %s1427_s21 = scalar_lea.vmem %s163_s20, 2048  ;;  %p1435_p11 = scmp.lt.s32.totalorder %s163_s20, %s163_s20 }
   0x8   : > { %p1377_p5 = pneg %p1516_p3  ;;  %p1428_p8 = scmp.ne.s32.totalorder %s163_s20, %s1427_s21 }
   0x9   : > { %p1436_p12 = scmp.lt.s32.totalorder %s1427_s21, %s1427_s21 }
   0xa   : > { %p1378_p6 = pnand %p1520_p4, %p1377_p5 }
   0xb   : > { %p1437_p13 = por %p1436_p12, %p1435_p11 }
   0xc   : > { %p1418_p7 = pneg %p1378_p6 }
   0xe   : > { %p1430_p9 = pnand %p1428_p8, %p1418_p7 }
  0x10   : > { %p1431_p10 = pneg %p1430_p9 }
  0x12   : > { %p1438_p0 = pnand %p1437_p13, %p1431_p10 }
  0x14   : > { %1441 = shalt.err (!%p1438_p0)
}
  0x15   : > { %s1471_s22 = smov 128   ;;  %s1472_s23 = smov 8  }
  0x16   : > { %1380 = dma.hbm_to_vmem [thread:$0]  (!%p1378_p6), %s1930_s1, 2048, %s163_s20, [#allocation3], %s1471_s22, %s1471_s22, %s1472_s23  }
  0x17   : > { %191 = sbr.rel (%p1516_p3) target bundleno = 388 (0x184), region = 32 }
  0x1c   : > { %1455 = dma.done.wait (%p1520_p4), [#allocation3], 2048  }
  0x1d   : > { %1457 = vsyncadd (%p1520_p4), [#allocation3], 4294965248  ;;  %v1473_v0 = vmov 0.0   ;;  %vm1474_vm0 = vmmov 0   ;;  %p219_p1 = scmp.lt.s32.totalorder %s1460_s12, 1  ;;  %v260_v1 = vld [vmem:[#allocation2 + $0x78] sm:$0xff] }
  0x1e   : > { %1163 = vmatprep.subr.mxu0 %v1473_v0  ;;  %1198 = vmatprep.subr.mxu1 %v1473_v0  ;;  %v259_v2 = vld [vmem:[#allocation2 + $0x70] sm:$0xff]  ;;  %v258_v3 = vld [vmem:[#allocation2 + $0x68] sm:$0xff]  ;;  %v1544_v4 = vand.u32 4294901760, %v260_v1  ;;  %v257_v7 = vld [vmem:[#allocation2 + $0x60] sm:$0xff] }
  0x1f   : > { %1195 = vmatprep.mubr.msk.f32.mxu0 %vm1474_vm0, %v1473_v0  ;;  %1230 = vmatprep.mubr.msk.f32.mxu1 %vm1474_vm0, %v1473_v0  ;;  %v1546_v5 = vand.u32 4294901760, %v259_v2  ;;  %v1548_v6 = vand.u32 4294901760, %v258_v3  ;;  %v256_v8 = vld [vmem:[#allocation2 + $0x58] sm:$0xff]  ;;  %v255_v9 = vld [vmem:[#allocation2 + $0x50] sm:$0xff]  ;;  %v1550_v10 = vand.u32 4294901760, %v257_v7  ;;  %v254_v13 = vld [vmem:[#allocation2 + $0x48] sm:$0xff] }
  0x20   : > { %v1552_v11 = vand.u32 4294901760, %v256_v8  ;;  %v1554_v12 = vand.u32 4294901760, %v255_v9  ;;  %v253_v14 = vld [vmem:[#allocation2 + $0x40] sm:$0xff]  ;;  %s1940_s12 = smov (!%p219_p1, %s1460_s12), 1  ;;  %1164 = vmatpush3.msra.mxu0 %v1544_v4  ;;  %v1563_v15 = vsub.f32 %v260_v1, %v1544_v4  ;;  %v1568_v17 = vand.u32 4294901760, %v254_v13  ;;  %v252_v19 = vld [vmem:[#allocation2 + $0x38] sm:$0xff] }
  0x21   : > { %v1566_v16 = vsub.f32 %v259_v2, %v1546_v5  ;;  %v1571_v18 = vsub.f32 %v258_v3, %v1548_v6  ;;  %1165 = vmatprep.subr.mxu0 %v1473_v0  ;;  %v1575_v20 = vsub.f32 %v257_v7, %v1550_v10  ;;  %v1584_v25 = vand.u32 4294901760, %v253_v14  ;;  %v251_v26 = vld [vmem:[#allocation2 + $0x30] sm:$0xff]  ;;  %s1056_s26 = sshll.u32 %s1940_s12, 3  ;;  %v250_v36 = vld [vmem:[#allocation2 + $0x28] sm:$0xff]  ;;  %v249_v41 = vld [vmem:[#allocation2 + $0x20] sm:$0xff] }
  0x22   : > { %v1578_v21 = vsub.f32 %v256_v8, %v1552_v11  ;;  %1166 = vmatpush3.msra.mxu0 %v1546_v5  ;;  %v355_v22 = vand.u32 4294901760, %v1563_v15  ;;  %v1588_v28 = vand.u32 4294901760, %v252_v19  ;;  %v1592_v30 = vsub.f32 %v255_v9, %v1554_v12  ;;  %s222_s29 = scalar_lea.vmem %s1929_s0, %s1056_s26  ;;  %v248_v49 = vld [vmem:[#allocation2 + $0x18] sm:$0xff]  ;;  %v247_v54 = vld [vmem:[#allocation2 + $0x10] sm:$0xff]  ;;  %v246_v60 = vld [vmem:[#allocation2 + $0x8] sm:$0xff]  ;;  %s233_s7 = scalar_lea.vmem %s1932_s3, %s1056_s26 }
  0x23   : > { %v362_v23 = vand.u32 4294901760, %v1566_v16  ;;  %v369_v24 = vand.u32 4294901760, %v1571_v18  ;;  %1167 = vmatprep.subr.mxu0 %v1473_v0  ;;  %v376_v27 = vand.u32 4294901760, %v1575_v20  ;;  %v1606_v34 = vsub.f32 %v254_v13, %v1568_v17  ;;  %v243_v50 = vld [vmem:[%s222_s29] sm:$0xff] }
  0x24   : > { %v383_v29 = vand.u32 4294901760, %v1578_v21  ;;  %1168 = vmatpush3.msra.mxu0 %v1548_v6  ;;  %v356_v31 = vsub.f32 %v1563_v15, %v355_v22  ;;  %v1609_v35 = vand.u32 4294901760, %v251_v26  ;;  %v390_v40 = vand.u32 4294901760, %v1592_v30  ;;  %v245_v7 = vld [vmem:[#allocation2] sm:$0xff] }
  0x25   : > { %v363_v32 = vsub.f32 %v1566_v16, %v362_v23  ;;  %v370_v33 = vsub.f32 %v1571_v18, %v369_v24  ;;  %1169 = vmatprep.subr.mxu0 %v1473_v0  ;;  %v377_v39 = vsub.f32 %v1575_v20, %v376_v27  ;;  %v1626_v43 = vsub.f32 %v253_v14, %v1584_v25 }
  0x26   : > { %1170 = vmatpush3.msra.mxu0 %v1550_v10  ;;  %v357_v37 = vand.u32 4294901760, %v356_v31  ;;  %v384_v42 = vsub.f32 %v1578_v21, %v383_v29  ;;  %v1629_v45 = vand.u32 4294901760, %v250_v36  ;;  %v397_v46 = vand.u32 4294901760, %v1606_v34 }
  0x27   : > { %v364_v38 = vand.u32 4294901760, %v363_v32  ;;  %1171 = vmatprep.subr.mxu0 %v1473_v0  ;;  %v371_v44 = vand.u32 4294901760, %v370_v33  ;;  %v1633_v47 = vsub.f32 %v252_v19, %v1588_v28  ;;  %v1637_v48 = vand.u32 4294901760, %v249_v41 }
  0x28   : > { %1172 = vmatpush3.msra.mxu0 %v1552_v11  ;;  %1199 = vmatpush3.msra.mxu1 %v357_v37  ;;  %v378_v51 = vand.u32 4294901760, %v377_v39  ;;  %v391_v52 = vsub.f32 %v1592_v30, %v390_v40  ;;  %v404_v53 = vand.u32 4294901760, %v1626_v43  ;;  %v1645_v55 = vsub.f32 %v251_v26, %v1609_v35 }
  0x29   : > { %1173 = vmatprep.subr.mxu0 %v1473_v0  ;;  %1200 = vmatprep.subr.mxu1 %v1473_v0  ;;  %v385_v56 = vand.u32 4294901760, %v384_v42  ;;  %v411_v57 = vand.u32 4294901760, %v1633_v47  ;;  %v398_v58 = vsub.f32 %v1606_v34, %v397_v46  ;;  %v1654_v59 = vand.u32 4294901760, %v248_v49 }
  0x2a   : > { %1174 = vmatpush3.msra.mxu0 %v1554_v12  ;;  %1201 = vmatpush3.msra.mxu1 %v364_v38  ;;  %v1657_v61 = vsub.f32 %v250_v36, %v1629_v45  ;;  %v1659_v62 = vand.u32 4294901760, %v243_v50  ;;  %v1663_v63 = vand.u32 4294901760, %v247_v54  ;;  %v392_v1 = vand.u32 4294901760, %v391_v52 }
  0x2b   : > { %1175 = vmatprep.subr.mxu0 %v1473_v0  ;;  %1202 = vmatprep.subr.mxu1 %v1473_v0  ;;  %v405_v2 = vsub.f32 %v1626_v43, %v404_v53  ;;  %v418_v3 = vand.u32 4294901760, %v1645_v55  ;;  %v1671_v8 = vsub.f32 %v249_v41, %v1637_v48  ;;  %v412_v9 = vsub.f32 %v1633_v47, %v411_v57 }
  0x2c   : > { %1176 = vmatpush3.msra.mxu0 %v1568_v17  ;;  %1203 = vmatpush3.msra.mxu1 %v371_v44  ;;  %v1678_v13 = vand.u32 4294901760, %v246_v60  ;;  %v399_v14 = vand.u32 4294901760, %v398_v58  ;;  %v425_v19 = vand.u32 4294901760, %v1657_v61  ;;  %v1683_v26 = vsub.f32 %v243_v50, %v1659_v62 }
  0x2d   : > { %1177 = vmatprep.subr.mxu0 %v1473_v0  ;;  %1204 = vmatprep.subr.mxu1 %v1473_v0  ;;  %v1686_v31 = vsub.f32 %v248_v49, %v1654_v59  ;;  %v1690_v32 = vand.u32 4294901760, %v245_v7  ;;  %v406_v33 = vand.u32 4294901760, %v405_v2  ;;  %v419_v36 = vsub.f32 %v1645_v55, %v418_v3 }
  0x2e   : > { %1178 = vmatpush3.msra.mxu0 %v1584_v25  ;;  %1205 = vmatpush3.msra.mxu1 %v378_v51  ;;  %v432_v37 = vand.u32 4294901760, %v1671_v8  ;;  %v1698_v38 = vsub.f32 %v247_v54, %v1663_v63  ;;  %v413_v39 = vand.u32 4294901760, %v412_v9  ;;  %v426_v41 = vsub.f32 %v1657_v61, %v425_v19 }
  0x2f   : > { %1179 = vmatprep.subr.mxu0 %v1473_v0  ;;  %1206 = vmatprep.subr.mxu1 %v1473_v0  ;;  %v344_v42 = vand.u32 4294901760, %v1683_v26  ;;  %v439_v44 = vand.u32 4294901760, %v1686_v31  ;;  %v1709_v49 = vsub.f32 %v246_v60, %v1678_v13  ;;  %v420_v50 = vand.u32 4294901760, %v419_v36 }
  0x30   : > { %1180 = vmatpush3.msra.mxu0 %v1588_v28  ;;  %1207 = vmatpush3.msra.mxu1 %v385_v56  ;;  %v433_v51 = vsub.f32 %v1671_v8, %v432_v37  ;;  %v446_v52 = vand.u32 4294901760, %v1698_v38  ;;  %v1719_v54 = vsub.f32 %v245_v7, %v1690_v32  ;;  %v427_v56 = vand.u32 4294901760, %v426_v41 }
  0x31   : > { %1181 = vmatprep.subr.mxu0 %v1473_v0  ;;  %1208 = vmatprep.subr.mxu1 %v1473_v0  ;;  %v345_v58 = vsub.f32 %v1683_v26, %v344_v42  ;;  %v440_v60 = vsub.f32 %v1686_v31, %v439_v44 }
  0x32   : > { %1182 = vmatpush3.msra.mxu0 %v1609_v35  ;;  %1209 = vmatpush3.msra.mxu1 %v392_v1  ;;  %v453_v1 = vand.u32 4294901760, %v1709_v49  ;;  %v434_v2 = vand.u32 4294901760, %v433_v51  ;;  %v447_v7 = vsub.f32 %v1698_v38, %v446_v52  ;;  %v460_v9 = vand.u32 4294901760, %v1719_v54 }
  0x33   : > { %1183 = vmatprep.subr.mxu0 %v1473_v0  ;;  %1210 = vmatprep.subr.mxu1 %v1473_v0 }
  0x34   : > { %1184 = vmatpush3.msra.mxu0 %v1629_v45  ;;  %1211 = vmatpush3.msra.mxu1 %v399_v14  ;;  %v346_v14 = vand.u32 4294901760, %v345_v58  ;;  %v454_v36 = vsub.f32 %v1709_v49, %v453_v1  ;;  %v461_v41 = vsub.f32 %v1719_v54, %v460_v9 }
  0x35   : > { %1185 = vmatprep.subr.mxu0 %v1473_v0  ;;  %1212 = vmatprep.subr.mxu1 %v1473_v0 }
  0x36   : > { %1186 = vmatpush3.msra.mxu0 %v1637_v48  ;;  %1213 = vmatpush3.msra.mxu1 %v406_v33  ;;  %v441_v33 = vand.u32 4294901760, %v440_v60  ;;  %v462_v51 = vand.u32 4294901760, %v461_v41 }
  0x37   : > { %1187 = vmatprep.subr.mxu0 %v1473_v0  ;;  %1214 = vmatprep.subr.mxu1 %v1473_v0 }
  0x38   : > { %1188 = vmatpush3.msra.mxu0 %v1654_v59  ;;  %1215 = vmatpush3.msra.mxu1 %v413_v39  ;;  %v448_v39 = vand.u32 4294901760, %v447_v7 }
  0x39   : > { %1189 = vmatprep.subr.mxu0 %v1473_v0  ;;  %1216 = vmatprep.subr.mxu1 %v1473_v0 }
  0x3a   : > { %1190 = vmatpush3.msra.mxu0 %v1663_v63  ;;  %1217 = vmatpush3.msra.mxu1 %v420_v50  ;;  %v455_v50 = vand.u32 4294901760, %v454_v36 }
  0x3b   : > { %1191 = vmatprep.subr.mxu0 %v1473_v0  ;;  %1218 = vmatprep.subr.mxu1 %v1473_v0 }
  0x3c   : > { %1192 = vmatpush3.msra.mxu0 %v1678_v13  ;;  %1219 = vmatpush3.msra.mxu1 %v427_v56 }
  0x3d   : > { %1193 = vmatprep.subr.mxu0 %v1473_v0  ;;  %1220 = vmatprep.subr.mxu1 %v1473_v0 }
  0x3e   : > { %1194 = vmatpush3.msra.mxu0 %v1690_v32  ;;  %1221 = vmatpush3.msra.mxu1 %v434_v2 }
  0x3f   : > { %1222 = vmatprep.subr.mxu1 %v1473_v0  ;;  %1233 = vmatprep.subr.mxu0 %v1473_v0 }
  0x40   : > { %1196 = vmatmul.mubr.f32.vlgmr.msra.gmra.mxu0 %v346_v14  ;;  %1223 = vmatpush3.msra.mxu1 %v441_v33 }
  0x41   : > { %1234 = vmatpush3.msra.mxu0 %v1563_v15  ;;  %1224 = vmatprep.subr.mxu1 %v1473_v0 }
  0x42   : > { %1235 = vmatprep.subr.mxu0 %v1473_v0  ;;  %1225 = vmatpush3.msra.mxu1 %v448_v39 }
  0x43   : > { %1236 = vmatpush3.msra.mxu0 %v1566_v16  ;;  %1226 = vmatprep.subr.mxu1 %v1473_v0 }
  0x44   : > { %1237 = vmatprep.subr.mxu0 %v1473_v0  ;;  %1227 = vmatpush3.msra.mxu1 %v455_v50 }
  0x45   : > { %1238 = vmatpush3.msra.mxu0 %v1571_v18  ;;  %1228 = vmatprep.subr.mxu1 %v1473_v0 }
  0x46   : > { %1239 = vmatprep.subr.mxu0 %v1473_v0  ;;  %1229 = vmatpush3.msra.mxu1 %v462_v51 }
  0x47   : > { %1240 = vmatpush3.msra.mxu0 %v1575_v20  ;;  %1231 = vmatmul.mubr.f32.vlgmr.msra.gmra.mxu1 %v1659_v62 }
  0x48   : > { %1241 = vmatprep.subr.mxu0 %v1473_v0  ;;  %1268 = vmatprep.subr.mxu1 %v1473_v0 }
  0x49   : > { %1242 = vmatpush3.msra.mxu0 %v1578_v21  ;;  %1269 = vmatpush3.msra.mxu1 %v1544_v4 }
  0x4a   : > { %1243 = vmatprep.subr.mxu0 %v1473_v0  ;;  %1270 = vmatprep.subr.mxu1 %v1473_v0 }
  0x4b   : > { %1244 = vmatpush3.msra.mxu0 %v1592_v30  ;;  %1271 = vmatpush3.msra.mxu1 %v1546_v5 }
  0x4c   : > { %1245 = vmatprep.subr.mxu0 %v1473_v0  ;;  %1272 = vmatprep.subr.mxu1 %v1473_v0 }
  0x4d   : > { %1246 = vmatpush3.msra.mxu0 %v1606_v34  ;;  %1273 = vmatpush3.msra.mxu1 %v1548_v6 }
  0x4e   : > { %1247 = vmatprep.subr.mxu0 %v1473_v0  ;;  %1274 = vmatprep.subr.mxu1 %v1473_v0 }
  0x4f   : > { %1248 = vmatpush3.msra.mxu0 %v1626_v43  ;;  %1275 = vmatpush3.msra.mxu1 %v1550_v10 }
  0x50   : > { %1249 = vmatprep.subr.mxu0 %v1473_v0  ;;  %1276 = vmatprep.subr.mxu1 %v1473_v0 }
  0x51   : > { %1250 = vmatpush3.msra.mxu0 %v1633_v47  ;;  %1277 = vmatpush3.msra.mxu1 %v1552_v11 }
  0x52   : > { %1251 = vmatprep.subr.mxu0 %v1473_v0  ;;  %1278 = vmatprep.subr.mxu1 %v1473_v0 }
  0x53   : > { %1252 = vmatpush3.msra.mxu0 %v1645_v55  ;;  %1279 = vmatpush3.msra.mxu1 %v1554_v12 }
  0x54   : > { %1253 = vmatprep.subr.mxu0 %v1473_v0  ;;  %1280 = vmatprep.subr.mxu1 %v1473_v0 }
  0x55   : > { %1254 = vmatpush3.msra.mxu0 %v1657_v61  ;;  %1281 = vmatpush3.msra.mxu1 %v1568_v17 }
  0x56   : > { %1255 = vmatprep.subr.mxu0 %v1473_v0  ;;  %1282 = vmatprep.subr.mxu1 %v1473_v0 }
  0x57   : > { %1256 = vmatpush3.msra.mxu0 %v1671_v8  ;;  %1283 = vmatpush3.msra.mxu1 %v1584_v25 }
  0x58   : > { %1257 = vmatprep.subr.mxu0 %v1473_v0  ;;  %1284 = vmatprep.subr.mxu1 %v1473_v0 }
  0x59   : > { %1258 = vmatpush3.msra.mxu0 %v1686_v31  ;;  %1285 = vmatpush3.msra.mxu1 %v1588_v28 }
  0x5a   : > { %1259 = vmatprep.subr.mxu0 %v1473_v0  ;;  %1286 = vmatprep.subr.mxu1 %v1473_v0 }
  0x5b   : > { %1260 = vmatpush3.msra.mxu0 %v1698_v38  ;;  %1287 = vmatpush3.msra.mxu1 %v1609_v35 }
  0x5c   : > { %1261 = vmatprep.subr.mxu0 %v1473_v0  ;;  %1288 = vmatprep.subr.mxu1 %v1473_v0 }
  0x5d   : > { %1262 = vmatpush3.msra.mxu0 %v1709_v49  ;;  %1289 = vmatpush3.msra.mxu1 %v1629_v45 }
  0x5e   : > { %1263 = vmatprep.subr.mxu0 %v1473_v0  ;;  %1290 = vmatprep.subr.mxu1 %v1473_v0 }
  0x5f   : > { %1264 = vmatpush3.msra.mxu0 %v1719_v54  ;;  %1265 = vmatprep.mubr.msk.f32.mxu0 %vm1474_vm0, %v1473_v0 }
  0x60   : > { %1291 = vmatpush3.msra.mxu1 %v1637_v48  ;;  %1266 = vmatmul.mubr.f32.vlgmr.msra.gmra.mxu0 %v1683_v26 }
  0x61   : > { %1292 = vmatprep.subr.mxu1 %v1473_v0  ;;  %1303 = vmatprep.subr.mxu0 %v1473_v0 }
  0x62   : > { %1293 = vmatpush3.msra.mxu1 %v1654_v59  ;;  %1304 = vmatpush3.msra.mxu0 %v355_v22 }
  0x63   : > { %1294 = vmatprep.subr.mxu1 %v1473_v0  ;;  %1305 = vmatprep.subr.mxu0 %v1473_v0 }
  0x64   : > { %1295 = vmatpush3.msra.mxu1 %v1663_v63  ;;  %1306 = vmatpush3.msra.mxu0 %v362_v23 }
  0x65   : > { %1296 = vmatprep.subr.mxu1 %v1473_v0  ;;  %1307 = vmatprep.subr.mxu0 %v1473_v0 }
  0x66   : > { %1297 = vmatpush3.msra.mxu1 %v1678_v13  ;;  %1308 = vmatpush3.msra.mxu0 %v369_v24 }
  0x67   : > { %1298 = vmatprep.subr.mxu1 %v1473_v0  ;;  %1309 = vmatprep.subr.mxu0 %v1473_v0 }
  0x68   : > { %1299 = vmatpush3.msra.mxu1 %v1690_v32  ;;  %1300 = vmatprep.mubr.msk.f32.mxu1 %vm1474_vm0, %v1473_v0 }
  0x69   : > { %1310 = vmatpush3.msra.mxu0 %v376_v27  ;;  %1301 = vmatmul.mubr.f32.vlgmr.msra.gmra.mxu1 %v344_v42 }
  0x6a   : > { %1311 = vmatprep.subr.mxu0 %v1473_v0  ;;  %1338 = vmatprep.subr.mxu1 %v1473_v0 }
  0x6b   : > { %1312 = vmatpush3.msra.mxu0 %v383_v29  ;;  %1339 = vmatpush3.msra.mxu1 %v1544_v4 }
  0x6c   : > { %1313 = vmatprep.subr.mxu0 %v1473_v0  ;;  %1340 = vmatprep.subr.mxu1 %v1473_v0 }
  0x6d   : > { %1314 = vmatpush3.msra.mxu0 %v390_v40  ;;  %1341 = vmatpush3.msra.mxu1 %v1546_v5 }
  0x6e   : > { %1315 = vmatprep.subr.mxu0 %v1473_v0  ;;  %1342 = vmatprep.subr.mxu1 %v1473_v0 }
  0x6f   : > { %1316 = vmatpush3.msra.mxu0 %v397_v46  ;;  %1343 = vmatpush3.msra.mxu1 %v1548_v6 }
  0x70   : > { %1317 = vmatprep.subr.mxu0 %v1473_v0  ;;  %1344 = vmatprep.subr.mxu1 %v1473_v0 }
  0x71   : > { %1318 = vmatpush3.msra.mxu0 %v404_v53  ;;  %1345 = vmatpush3.msra.mxu1 %v1550_v10 }
  0x72   : > { %1319 = vmatprep.subr.mxu0 %v1473_v0  ;;  %1346 = vmatprep.subr.mxu1 %v1473_v0 }
  0x73   : > { %1320 = vmatpush3.msra.mxu0 %v411_v57  ;;  %1347 = vmatpush3.msra.mxu1 %v1552_v11 }
  0x74   : > { %1321 = vmatprep.subr.mxu0 %v1473_v0  ;;  %1348 = vmatprep.subr.mxu1 %v1473_v0 }
  0x75   : > { %1322 = vmatpush3.msra.mxu0 %v418_v3  ;;  %1349 = vmatpush3.msra.mxu1 %v1554_v12 }
  0x76   : > { %1323 = vmatprep.subr.mxu0 %v1473_v0  ;;  %1350 = vmatprep.subr.mxu1 %v1473_v0 }
  0x77   : > { %1324 = vmatpush3.msra.mxu0 %v425_v19  ;;  %1351 = vmatpush3.msra.mxu1 %v1568_v17 }
  0x78   : > { %1325 = vmatprep.subr.mxu0 %v1473_v0  ;;  %1352 = vmatprep.subr.mxu1 %v1473_v0 }
  0x79   : > { %1326 = vmatpush3.msra.mxu0 %v432_v37  ;;  %1353 = vmatpush3.msra.mxu1 %v1584_v25  ;;  %v1058_v25 = vld [vmem:[%s1931_s2] ss:$0 sm:$0xff] }
  0x7a   : > { %1327 = vmatprep.subr.mxu0 %v1473_v0  ;;  %1354 = vmatprep.subr.mxu1 %v1473_v0 }
  0x7b   : > { %1328 = vmatpush3.msra.mxu0 %v439_v44  ;;  %1355 = vmatpush3.msra.mxu1 %v1588_v28 }
  0x7c   : > { %1329 = vmatprep.subr.mxu0 %v1473_v0  ;;  %1356 = vmatprep.subr.mxu1 %v1473_v0 }
  0x7d   : > { %1330 = vmatpush3.msra.mxu0 %v446_v52  ;;  %1357 = vmatpush3.msra.mxu1 %v1609_v35 }
  0x7e   : > { %1331 = vmatprep.subr.mxu0 %v1473_v0  ;;  %1358 = vmatprep.subr.mxu1 %v1473_v0 }
  0x7f   : > { %1332 = vmatpush3.msra.mxu0 %v453_v1  ;;  %1359 = vmatpush3.msra.mxu1 %v1629_v45 }
  0x80   : > { %1333 = vmatprep.subr.mxu0 %v1473_v0  ;;  %1360 = vmatprep.subr.mxu1 %v1473_v0 }
  0x81   : > { %1334 = vmatpush3.msra.mxu0 %v460_v9  ;;  %1335 = vmatprep.mubr.msk.f32.mxu0 %vm1474_vm0, %v1473_v0 }
  0x82   : > { %1361 = vmatpush3.msra.mxu1 %v1637_v48  ;;  %1336 = vmatmul.mubr.f32.vlgmr.msra.gmra.mxu0 %v1659_v62 }
  0x83   : > { %1362 = vmatprep.subr.mxu1 %v1473_v0  ;;  %1370 = vmatprep.mubr.msk.f32.mxu1 %vm1474_vm0, %v1473_v0 }
  0x84   : > { %1363 = vmatpush3.msra.mxu1 %v1654_v59 }
  0x85   : > { %1364 = vmatprep.subr.mxu1 %v1473_v0 }
  0x86   : > { %1365 = vmatpush3.msra.mxu1 %v1663_v63 }
  0x87   : > { %1366 = vmatprep.subr.mxu1 %v1473_v0 }
  0x88   : > { %1367 = vmatpush3.msra.mxu1 %v1678_v13 }
  0x89   : > { %1368 = vmatprep.subr.mxu1 %v1473_v0 }
  0x8a   : > { %1369 = vmatpush3.msra.mxu1 %v1690_v32 }
  0x8b   : > { %1371 = vmatmul.mubr.f32.vlgmr.msra.gmra.mxu1 %v1659_v62 }
 0x100   : > { %v348_v4 = vpop.f32.mrf.mxu0 }
 0x102   : > { %v1197_v5 = vpop.f32.mrf.mxu0 }
 0x107   : > { %v499_v6 = vpop.f32.mrf.mxu1 }
 0x108   : > { %v500_v18 = vadd.f32 %v499_v6, %v348_v4 }
 0x109   : > { %v1232_v10 = vpop.f32.mrf.mxu1 }
 0x120   : > { %v603_v11 = vpop.f32.mrf.mxu0 }
 0x121   : > { %v604_v21 = vadd.f32 %v603_v11, %v500_v18 }
 0x122   : > { %v1267_v12 = vpop.f32.mrf.mxu0 }
 0x129   : > { %v692_v15 = vpop.f32.mrf.mxu1 }
 0x12a   : > { %v693_v22 = vadd.f32 %v692_v15, %v604_v21 }
 0x12b   : > { %v1302_v16 = vpop.f32.mrf.mxu1 }
 0x142   : > { %v811_v17 = vpop.f32.mrf.mxu0 }
 0x143   : > { %v812_v23 = vadd.f32 %v811_v17, %v693_v22 }
 0x144   : > { %v1337_v20 = vpop.f32.mrf.mxu0 }
 0x14b   : > { %v898_v24 = vpop.f32.mrf.mxu1 }
 0x14c   : > { %v899_v0 = vadd.f32 %v898_v24, %v812_v23 }
 0x14d   : > { %v1372_v27 = vpop.f32.mrf.mxu1 }
 0x14e   : > { %v915_v28 = vadd.f32 %v1058_v25, %v899_v0 }
 0x150   : > { %v917_v29 = vmul.f32 0.70710677, %v915_v28  ;;  %v916_v31 = vmul.f32 0.5, %v915_v28 }
 0x152   : > { %v918_v30 = vand.u32 2147483647, %v917_v29  ;;  %vm938_vm1 = vcmp.lt.f32.partialorder %v917_v29, 0.0 }
 0x154   : > { %v919_v34 = vmul.f32 0.3275911, %v918_v30  ;;  %v932_v40 = vmul.f32 %v918_v30, %v918_v30 }
 0x156   : > { %v920_v35 = vadd.f32 1.0, %v919_v34  ;;  %v933_v43 = vsub.f32 0.0, %v932_v40 }
 0x158   : > { %1412 = vrcp.f32 %v920_v35  ;;  %v934_v47 = vmul.f32 1.442695, %v933_v43 }
 0x15a   : > { %1414 = vpow2.f32 %v934_v47 }
 0x165   : > { %v1413_v45 = vpop.eup %1412 }
 0x166   : > { %v923_v46 = vmul.f32 1.0614054, %v1413_v45 }
 0x167   : > { %v1415_v3 = vpop.eup %1414 }
 0x168   : > { %v924_v48 = vadd.f32 -1.4531521, %v923_v46 }
 0x16a   : > { %v925_v53 = vmul.f32 %v1413_v45, %v924_v48 }
 0x16c   : > { %v926_v55 = vadd.f32 1.4214138, %v925_v53 }
 0x16e   : > { %v927_v57 = vmul.f32 %v1413_v45, %v926_v55 }
 0x170   : > { %v928_v59 = vadd.f32 -0.28449672, %v927_v57 }
 0x172   : > { %v929_v61 = vmul.f32 %v1413_v45, %v928_v59 }
 0x174   : > { %v930_v62 = vadd.f32 0.2548296, %v929_v61 }
 0x176   : > { %v931_v63 = vmul.f32 %v1413_v45, %v930_v62 }
 0x178   : > { %v936_v8 = vmul.f32 %v1415_v3, %v931_v63 }
 0x17a   : > { %v937_v13 = vsub.f32 1.0, %v936_v8 }
 0x17c   : > { %v939_v19 = vsub.f32 0.0, %v937_v13 }
 0x17e   : > { %v940_v26 = vsel %vm938_vm1, %v939_v19, %v937_v13 }
 0x17f   : > { %v941_v32 = vadd.f32 1.0, %v940_v26 }
 0x181   : > { %v942_v37 = vmul.f32 %v941_v32, %v916_v31 }
 0x183   : > { %943 = vst [vmem:[%s233_s7] sm:$0xff] %v942_v37 }
 0x184 PF: > { %s14_s14 = sadd.s32 1, %s1468_s14   ;;  %s1935_s12 = smov %s1464_s13 }
 0x185   : > { %p11_p2 = scmp.ge.s32.totalorder %s14_s14, 4   ;;  %s1936_s13 = smov %s1938_s16 }
 0x187   :  { %13 = sbr.rel (!%p11_p2) target bundleno = 2 (0x2), region = 80 }
 0x18c   :  { %969 = vsyncpa [#allocation3], 1 }
 0x18d   :  { %971 = vsyncpa [#allocation3 + $0x1], 1 }

</bundles_post_ra>
